<compile_context>
chip_gen: v6e
topology: v6e:2x2x1
jax: 0.10.0
libtpu: 0.0.40
codegen_flags: <defaults>
</compile_context>

<pallas_src>
import functools

import jax
import jax.numpy as jnp
from jax.experimental import pallas as pl
from jax.experimental.pallas import tpu as pltpu


def _mha_kernel(x_ref, wcat_ref, wo_ref, o_ref, z_scr, *,
                B, T, E, H, DV, C, q_off, k_off, v_off):
    """Whole forward pass in one kernel invocation; everything stays in VMEM."""
    # ---- fused QKV projection: one wide, lane-dense matmul --------------------
    x = x_ref[...].reshape(B * T, E)                       # leading-dim merge only
    proj = jnp.dot(x, wcat_ref[...],
                   preferred_element_type=jnp.float32)     # (B*T, Ncat_padded)

    # ---- gather per-(batch, head) operands by static in-register slicing ------
    q_list, k_list, v_list = [], [], []
    for b in range(B):
        r0 = b * T
        for h in range(H):
            q_list.append(proj[r0:r0 + T, q_off + h * E:q_off + (h + 1) * E])
            v_list.append(proj[r0:r0 + T, v_off + h * DV:v_off + (h + 1) * DV])
            # K.view(e, t) quirk: stack K's C contiguous T-wide column chunks
            # vertically -> (E, T).  With Q's columns pre-permuted chunk-major
            # (wrapper prep, scale folded in) the score contraction is then ONE
            # full-depth (T, E) @ (E, T) matmul per (batch, head).
            kc = k_off + h * E
            k_list.append(jnp.concatenate(
                [proj[r0:r0 + T, kc + c * T:kc + (c + 1) * T] for c in range(C)],
                axis=0))
    q_st = jnp.stack(q_list, axis=0)                       # (B*H, T, E)
    k_st = jnp.stack(k_list, axis=0)                       # (B*H, E, T)
    v_st = jnp.stack(v_list, axis=0)                       # (B*H, T, DV)

    # ---- scores + softmax, batched across all (batch, head) tiles -------------
    scores = jnp.einsum('gik,gkj->gij', q_st, k_st,
                        preferred_element_type=jnp.float32)  # (B*H, T, T)
    # torch nn.Softmax(1): normalize over the QUERY axis (axis 1 here).
    m = jnp.max(scores, axis=1, keepdims=True)
    ex = jnp.exp(scores - m)
    denom = jnp.sum(ex, axis=1, keepdims=True)
    attn = ex * pl.reciprocal(denom, approx=True)          # EUP slot, ~free

    z = jnp.einsum('gij,gjd->gid', attn, v_st,
                   preferred_element_type=jnp.float32)     # (B*H, T, DV)

    # ---- epilogue: Zt = Z.reshape(b, t, H*DV) (row-major quirk) then Zt @ WO --
    # Stage Z in a VMEM scratch and realize the row-major regrouping as strided
    # sublane reads (ld/XLU slots), replacing the old selection-matrix matmuls.
    z_scr[...] = z.reshape(B * H * T, DV)
    zt_rows = []
    for b in range(B):
        base = b * H * T
        cols = [z_scr[pl.ds(base + g, T, stride=H), :] for g in range(H)]
        zt_rows.append(jnp.concatenate(cols, axis=1))      # (T, H*DV)
    zt = jnp.concatenate(zt_rows, axis=0)                  # (B*T, H*DV)

    out = jnp.dot(zt, wo_ref[...], preferred_element_type=jnp.float32)  # (B*T, E)
    # TODO(synk): E=32 < 128 lanes -> masked store; keeping the module's
    # (B, T, E) output interface (modest cost at these sizes).
    o_ref[...] = out.reshape(B, T, E)


def prepare_weights(wq, wk, wv, wo, num_tokens):
    """One-time weight preparation.  Cache the result across forward calls.

    wq/wk: (H, E, Dk), wv: (H, E, Dv), wo: (H*Dv, E); requires Dk == E (the
    K.view quirk) and T | E (chunk-folded layout).
    Returns (w_cat, wo) where w_cat is (E, ceil(H*(2E+Dv)/128)*128).
    """
    h, e, dk = wq.shape
    dv = wv.shape[2]
    t = num_tokens
    if dk != e:
        raise ValueError(f"K.view(b, e, t) requires dk == embed_dim ({dk} != {e})")
    if e % t != 0:
        raise ValueError(f"embed_dim ({e}) must be divisible by num_tokens ({t})")
    c = e // t
    scale = 1.0 / float(t) ** 0.5  # torch: scores / K.size(1)**0.5 == 1/sqrt(T)

    # Q columns regrouped chunk-major so the in-kernel score contraction is a
    # single full-depth matmul against the stacked-K layout; scale folded in.
    wq_perm = (wq.reshape(h, e, t, c).transpose(0, 1, 3, 2).reshape(h, e, e)
               * scale)                                             # (H, E, E)
    wq_cat = jnp.transpose(wq_perm, (1, 0, 2)).reshape(e, h * e)    # (E, H*E)
    wk_cat = jnp.transpose(wk, (1, 0, 2)).reshape(e, h * e)         # (E, H*E)
    wv_cat = jnp.transpose(wv, (1, 0, 2)).reshape(e, h * dv)        # (E, H*Dv)
    w_cat = jnp.concatenate([wq_cat, wk_cat, wv_cat], axis=1).astype(jnp.float32)

    ncat = w_cat.shape[1]
    ncat_pad = ((ncat + 127) // 128) * 128                          # lane-dense
    if ncat_pad != ncat:
        w_cat = jnp.pad(w_cat, ((0, 0), (0, ncat_pad - ncat)))
    return w_cat, wo.astype(jnp.float32)


def mha_forward(x, w_cat, wo, *, num_heads):
    """Fused Pallas forward.  x: (B, T, E) f32; w_cat/wo from prepare_weights."""
    b, t, e = x.shape
    h = num_heads
    dv = wo.shape[0] // h
    c = e // t
    ncat = w_cat.shape[1]

    kernel = functools.partial(
        _mha_kernel, B=b, T=t, E=e, H=h, DV=dv, C=c,
        q_off=0, k_off=h * e, v_off=2 * h * e)

    return pl.pallas_call(
        kernel,
        out_shape=jax.ShapeDtypeStruct((b, t, e), jnp.float32),
        grid=(1,),  # whole batch in one step: no per-batch grid/DMA overhead
        in_specs=[
            pl.BlockSpec((b, t, e), lambda i: (0, 0, 0)),
            pl.BlockSpec((e, ncat), lambda i: (0, 0)),
            pl.BlockSpec((h * dv, e), lambda i: (0, 0)),
        ],
        out_specs=pl.BlockSpec((b, t, e), lambda i: (0, 0, 0)),
        scratch_shapes=[pltpu.VMEM((b * h * t, dv), jnp.float32)],
        # Single grid step: no cross-TC split attempted (per review, a 2-TC
        # split of a ~us kernel is not an assumed win).
        compiler_params=pltpu.CompilerParams(
            dimension_semantics=("arbitrary",)),
    )(x, w_cat, wo)


def _reference(x, wq, wk, wv, wo):
    """Pure-JAX mirror of the PyTorch forward (including its quirks)."""
    b, t, e = x.shape
    h = wq.shape[0]
    dv = wv.shape[2]
    zs = []
    for hh in range(h):
        q = x @ wq[hh]
        k = x @ wk[hh]
        v = x @ wv[hh]
        scores = q @ k.reshape(b, e, t)              # reshape, not transpose
        a = jax.nn.softmax(scores / float(t) ** 0.5, axis=1)
        zs.append(a @ v)
    z = jnp.stack(zs, axis=1)                        # (b, h, t, dv)
    zt = z.reshape(b, t, h * dv)
    return zt @ wo


if __name__ == "__main__":
    B, H, T, E = 2, 2, 8, 32
    DK = DV = E  # module defaults: dk = dv = embed_dim

    key = jax.random.PRNGKey(0)
    kx, kq, kk, kv, ko = jax.random.split(key, 5)
    x = jax.random.normal(kx, (B, T, E), dtype=jnp.float32)
    # 0.2x weight scale keeps the (query-axis) softmax away from saturation so
    # the normalization path is actually exercised by the check below.
    wq = 0.2 * jax.random.normal(kq, (H, E, DK), dtype=jnp.float32)
    wk = 0.2 * jax.random.normal(kk, (H, E, DK), dtype=jnp.float32)
    wv = 0.2 * jax.random.normal(kv, (H, E, DV), dtype=jnp.float32)
    wo = 0.2 * jax.random.normal(ko, (H * DV, E), dtype=jnp.float32)

    # One-time prep (cache these across calls in real use).
    w_cat, wo_p = prepare_weights(wq, wk, wv, wo, num_tokens=T)

    out = jax.block_until_ready(mha_forward(x, w_cat, wo_p, num_heads=H))
    ref = _reference(x, wq, wk, wv, wo)

    assert out.shape == (B, T, E), out.shape
    # Slightly loose tolerance: the softmax denominator uses the EUP
    # approximate reciprocal.
    assert jnp.allclose(out, ref, atol=5e-3, rtol=5e-3), (
        "mismatch vs JAX reference, max abs err = "
        f"{float(jnp.max(jnp.abs(out - ref)))}")
    print("KERNEL_OK")
</pallas_src>

<mosaic_0001>
module attributes {stable_mosaic.version = 11 : i64} {
  func.func @_mha_kernel(%arg0: i32, %arg1: memref<2x8x32xf32, #tpu.memory_space<vmem>>, %arg2: memref<32x256xf32, #tpu.memory_space<vmem>>, %arg3: memref<64x32xf32, #tpu.memory_space<vmem>>, %arg4: memref<2x8x32xf32, #tpu.memory_space<vmem>>, %arg5: memref<32x32xf32, #tpu.memory_space<vmem>>) attributes {dimension_semantics = [#tpu.dimension_semantics<arbitrary>], iteration_bounds = array<i64: 1>, scalar_prefetch = 0 : i64, scratch_operands = 1 : i64, tpu.core_type = #tpu.core_type<tc>, window_params = [{pipeline_mode = #tpu.pipeline_mode<synchronous>, transform_indices = @transform_0, window_bounds = array<i64: 2, 8, 32>}, {pipeline_mode = #tpu.pipeline_mode<synchronous>, transform_indices = @transform_1, window_bounds = array<i64: 32, 256>}, {pipeline_mode = #tpu.pipeline_mode<synchronous>, transform_indices = @transform_2, window_bounds = array<i64: 64, 32>}, {pipeline_mode = #tpu.pipeline_mode<synchronous>, transform_indices = @transform_3, window_bounds = array<i64: 2, 8, 32>}]} {
    %c0 = arith.constant 0 : index
    %c0_0 = arith.constant 0 : index
    %c0_1 = arith.constant 0 : index
    %0 = vector.load %arg1[%c0, %c0_0, %c0_1] : memref<2x8x32xf32, #tpu.memory_space<vmem>>, vector<2x8x32xf32>
    %1 = vector.shape_cast %0 : vector<2x8x32xf32> to vector<16x32xf32>
    %c0_2 = arith.constant 0 : index
    %c0_3 = arith.constant 0 : index
    %2 = vector.load %arg2[%c0_2, %c0_3] : memref<32x256xf32, #tpu.memory_space<vmem>>, vector<32x256xf32>
    %cst = arith.constant dense<0.000000e+00> : vector<16x256xf32>
    %3 = tpu.matmul %1, %2, %cst {dimension_numbers = #tpu.dot_dimension_numbers<[1], [0], [0], [1], [0, 0, 1, 1], [], []>} : vector<16x32xf32>, vector<32x256xf32>, vector<16x256xf32> -> vector<16x256xf32>
    %4 = vector.extract_strided_slice %3 {offsets = [0, 0], sizes = [8, 32], strides = [1, 1]} : vector<16x256xf32> to vector<8x32xf32>
    %5 = vector.extract_strided_slice %3 {offsets = [0, 128], sizes = [8, 32], strides = [1, 1]} : vector<16x256xf32> to vector<8x32xf32>
    %6 = vector.extract_strided_slice %3 {offsets = [0, 64], sizes = [8, 8], strides = [1, 1]} : vector<16x256xf32> to vector<8x8xf32>
    %7 = vector.extract_strided_slice %3 {offsets = [0, 72], sizes = [8, 8], strides = [1, 1]} : vector<16x256xf32> to vector<8x8xf32>
    %8 = vector.extract_strided_slice %3 {offsets = [0, 80], sizes = [8, 8], strides = [1, 1]} : vector<16x256xf32> to vector<8x8xf32>
    %9 = vector.extract_strided_slice %3 {offsets = [0, 88], sizes = [8, 8], strides = [1, 1]} : vector<16x256xf32> to vector<8x8xf32>
    %10 = tpu.concatenate %6, %7, %8, %9 in 0 : vector<8x8xf32>, vector<8x8xf32>, vector<8x8xf32>, vector<8x8xf32> -> vector<32x8xf32>
    %11 = vector.extract_strided_slice %3 {offsets = [0, 32], sizes = [8, 32], strides = [1, 1]} : vector<16x256xf32> to vector<8x32xf32>
    %12 = vector.extract_strided_slice %3 {offsets = [0, 160], sizes = [8, 32], strides = [1, 1]} : vector<16x256xf32> to vector<8x32xf32>
    %13 = vector.extract_strided_slice %3 {offsets = [0, 96], sizes = [8, 8], strides = [1, 1]} : vector<16x256xf32> to vector<8x8xf32>
    %14 = vector.extract_strided_slice %3 {offsets = [0, 104], sizes = [8, 8], strides = [1, 1]} : vector<16x256xf32> to vector<8x8xf32>
    %15 = vector.extract_strided_slice %3 {offsets = [0, 112], sizes = [8, 8], strides = [1, 1]} : vector<16x256xf32> to vector<8x8xf32>
    %16 = vector.extract_strided_slice %3 {offsets = [0, 120], sizes = [8, 8], strides = [1, 1]} : vector<16x256xf32> to vector<8x8xf32>
    %17 = tpu.concatenate %13, %14, %15, %16 in 0 : vector<8x8xf32>, vector<8x8xf32>, vector<8x8xf32>, vector<8x8xf32> -> vector<32x8xf32>
    %18 = vector.extract_strided_slice %3 {offsets = [8, 0], sizes = [8, 32], strides = [1, 1]} : vector<16x256xf32> to vector<8x32xf32>
    %19 = vector.extract_strided_slice %3 {offsets = [8, 128], sizes = [8, 32], strides = [1, 1]} : vector<16x256xf32> to vector<8x32xf32>
    %20 = vector.extract_strided_slice %3 {offsets = [8, 64], sizes = [8, 8], strides = [1, 1]} : vector<16x256xf32> to vector<8x8xf32>
    %21 = vector.extract_strided_slice %3 {offsets = [8, 72], sizes = [8, 8], strides = [1, 1]} : vector<16x256xf32> to vector<8x8xf32>
    %22 = vector.extract_strided_slice %3 {offsets = [8, 80], sizes = [8, 8], strides = [1, 1]} : vector<16x256xf32> to vector<8x8xf32>
    %23 = vector.extract_strided_slice %3 {offsets = [8, 88], sizes = [8, 8], strides = [1, 1]} : vector<16x256xf32> to vector<8x8xf32>
    %24 = tpu.concatenate %20, %21, %22, %23 in 0 : vector<8x8xf32>, vector<8x8xf32>, vector<8x8xf32>, vector<8x8xf32> -> vector<32x8xf32>
    %25 = vector.extract_strided_slice %3 {offsets = [8, 32], sizes = [8, 32], strides = [1, 1]} : vector<16x256xf32> to vector<8x32xf32>
    %26 = vector.extract_strided_slice %3 {offsets = [8, 160], sizes = [8, 32], strides = [1, 1]} : vector<16x256xf32> to vector<8x32xf32>
    %27 = vector.extract_strided_slice %3 {offsets = [8, 96], sizes = [8, 8], strides = [1, 1]} : vector<16x256xf32> to vector<8x8xf32>
    %28 = vector.extract_strided_slice %3 {offsets = [8, 104], sizes = [8, 8], strides = [1, 1]} : vector<16x256xf32> to vector<8x8xf32>
    %29 = vector.extract_strided_slice %3 {offsets = [8, 112], sizes = [8, 8], strides = [1, 1]} : vector<16x256xf32> to vector<8x8xf32>
    %30 = vector.extract_strided_slice %3 {offsets = [8, 120], sizes = [8, 8], strides = [1, 1]} : vector<16x256xf32> to vector<8x8xf32>
    %31 = tpu.concatenate %27, %28, %29, %30 in 0 : vector<8x8xf32>, vector<8x8xf32>, vector<8x8xf32>, vector<8x8xf32> -> vector<32x8xf32>
    %32 = vector.shape_cast %4 : vector<8x32xf32> to vector<1x8x32xf32>
    %33 = vector.shape_cast %11 : vector<8x32xf32> to vector<1x8x32xf32>
    %34 = vector.shape_cast %18 : vector<8x32xf32> to vector<1x8x32xf32>
    %35 = vector.shape_cast %25 : vector<8x32xf32> to vector<1x8x32xf32>
    %36 = tpu.concatenate %32, %33, %34, %35 in 0 : vector<1x8x32xf32>, vector<1x8x32xf32>, vector<1x8x32xf32>, vector<1x8x32xf32> -> vector<4x8x32xf32>
    %37 = vector.shape_cast %10 : vector<32x8xf32> to vector<1x32x8xf32>
    %38 = vector.shape_cast %17 : vector<32x8xf32> to vector<1x32x8xf32>
    %39 = vector.shape_cast %24 : vector<32x8xf32> to vector<1x32x8xf32>
    %40 = vector.shape_cast %31 : vector<32x8xf32> to vector<1x32x8xf32>
    %41 = tpu.concatenate %37, %38, %39, %40 in 0 : vector<1x32x8xf32>, vector<1x32x8xf32>, vector<1x32x8xf32>, vector<1x32x8xf32> -> vector<4x32x8xf32>
    %42 = vector.shape_cast %5 : vector<8x32xf32> to vector<1x8x32xf32>
    %43 = vector.shape_cast %12 : vector<8x32xf32> to vector<1x8x32xf32>
    %44 = vector.shape_cast %19 : vector<8x32xf32> to vector<1x8x32xf32>
    %45 = vector.shape_cast %26 : vector<8x32xf32> to vector<1x8x32xf32>
    %46 = tpu.concatenate %42, %43, %44, %45 in 0 : vector<1x8x32xf32>, vector<1x8x32xf32>, vector<1x8x32xf32>, vector<1x8x32xf32> -> vector<4x8x32xf32>
    "tpu.trace_start"() <{level = 10 : i32, message = "gik,gkj->gij"}> : () -> ()
    %cst_4 = arith.constant dense<0.000000e+00> : vector<4x8x8xf32>
    %47 = tpu.matmul %36, %41, %cst_4 {dimension_numbers = #tpu.dot_dimension_numbers<[2], [1], [1], [2], [0, 0, 0, 1, 1, 2], [0], [0]>} : vector<4x8x32xf32>, vector<4x32x8xf32>, vector<4x8x8xf32> -> vector<4x8x8xf32>
    "tpu.trace_stop"() : () -> ()
    %cst_5 = arith.constant dense<0xFF800000> : vector<4x8xf32>
    %48 = vector.multi_reduction <maximumf>, %47, %cst_5 [1] : vector<4x8x8xf32> to vector<4x8xf32>
    %49 = vector.shape_cast %48 : vector<4x8xf32> to vector<4x1x8xf32>
    %50 = vector.broadcast %49 : vector<4x1x8xf32> to vector<4x8x8xf32>
    %51 = arith.subf %47, %50 : vector<4x8x8xf32>
    %52 = math.exp %51 : vector<4x8x8xf32>
    %cst_6 = arith.constant dense<0.000000e+00> : vector<4x8xf32>
    %53 = vector.multi_reduction <add>, %52, %cst_6 [1] : vector<4x8x8xf32> to vector<4x8xf32>
    %54 = vector.shape_cast %53 : vector<4x8xf32> to vector<4x1x8xf32>
    %55 = tpu.reciprocal %54 {approx = true} : vector<4x1x8xf32> -> vector<4x1x8xf32>
    %56 = vector.broadcast %55 : vector<4x1x8xf32> to vector<4x8x8xf32>
    %57 = arith.mulf %52, %56 : vector<4x8x8xf32>
    "tpu.trace_start"() <{level = 10 : i32, message = "gij,gjd->gid"}> : () -> ()
    %cst_7 = arith.constant dense<0.000000e+00> : vector<4x8x32xf32>
    %58 = tpu.matmul %57, %46, %cst_7 {dimension_numbers = #tpu.dot_dimension_numbers<[2], [1], [1], [2], [0, 0, 0, 1, 1, 2], [0], [0]>} : vector<4x8x8xf32>, vector<4x8x32xf32>, vector<4x8x32xf32> -> vector<4x8x32xf32>
    "tpu.trace_stop"() : () -> ()
    %59 = vector.shape_cast %58 : vector<4x8x32xf32> to vector<32x32xf32>
    %c0_8 = arith.constant 0 : index
    %c0_9 = arith.constant 0 : index
    %60 = vector.load %arg5[%c0_8, %c0_9] : memref<32x32xf32, #tpu.memory_space<vmem>>, vector<32x32xf32>
    tpu.vector_store %arg5[%c0_8, %c0_9], %59 {strides = array<i32>} : memref<32x32xf32, #tpu.memory_space<vmem>>, vector<32x32xf32>,
    %c0_10 = arith.constant 0 : index
    %c0_11 = arith.constant 0 : index
    %61 = tpu.strided_load %arg5[%c0_10, %c0_11] {strides = array<i32: 2, 1>} : memref<32x32xf32, #tpu.memory_space<vmem>>, vector<8x32xf32>
    %c1 = arith.constant 1 : index
    %c0_12 = arith.constant 0 : index
    %62 = tpu.strided_load %arg5[%c1, %c0_12] {strides = array<i32: 2, 1>} : memref<32x32xf32, #tpu.memory_space<vmem>>, vector<8x32xf32>
    %63 = tpu.concatenate %61, %62 in 1 : vector<8x32xf32>, vector<8x32xf32> -> vector<8x64xf32>
    %c16 = arith.constant 16 : index
    %c0_13 = arith.constant 0 : index
    %64 = tpu.strided_load %arg5[%c16, %c0_13] {strides = array<i32: 2, 1>} : memref<32x32xf32, #tpu.memory_space<vmem>>, vector<8x32xf32>
    %c17 = arith.constant 17 : index
    %c0_14 = arith.constant 0 : index
    %65 = tpu.strided_load %arg5[%c17, %c0_14] {strides = array<i32: 2, 1>} : memref<32x32xf32, #tpu.memory_space<vmem>>, vector<8x32xf32>
    %66 = tpu.concatenate %64, %65 in 1 : vector<8x32xf32>, vector<8x32xf32> -> vector<8x64xf32>
    %67 = tpu.concatenate %63, %66 in 0 : vector<8x64xf32>, vector<8x64xf32> -> vector<16x64xf32>
    %c0_15 = arith.constant 0 : index
    %c0_16 = arith.constant 0 : index
    %68 = vector.load %arg3[%c0_15, %c0_16] : memref<64x32xf32, #tpu.memory_space<vmem>>, vector<64x32xf32>
    %cst_17 = arith.constant dense<0.000000e+00> : vector<16x32xf32>
    %69 = tpu.matmul %67, %68, %cst_17 {dimension_numbers = #tpu.dot_dimension_numbers<[1], [0], [0], [1], [0, 0, 1, 1], [], []>} : vector<16x64xf32>, vector<64x32xf32>, vector<16x32xf32> -> vector<16x32xf32>
    %70 = vector.shape_cast %69 : vector<16x32xf32> to vector<2x8x32xf32>
    %c0_18 = arith.constant 0 : index
    %c0_19 = arith.constant 0 : index
    %c0_20 = arith.constant 0 : index
    %71 = vector.load %arg4[%c0_18, %c0_19, %c0_20] : memref<2x8x32xf32, #tpu.memory_space<vmem>>, vector<2x8x32xf32>
    tpu.vector_store %arg4[%c0_18, %c0_19, %c0_20], %70 {strides = array<i32>} : memref<2x8x32xf32, #tpu.memory_space<vmem>>, vector<2x8x32xf32>,
    return
  }
  func.func @transform_0(%arg0: i32) -> (i32, i32, i32) {
    %c0_i32 = arith.constant 0 : i32
    %c0_i32_0 = arith.constant 0 : i32
    %c0_i32_1 = arith.constant 0 : i32
    %c0_i32_2 = arith.constant 0 : i32
    return %c0_i32, %c0_i32_0, %c0_i32_1 : i32, i32, i32
  }
  func.func @transform_1(%arg0: i32) -> (i32, i32) {
    %c0_i32 = arith.constant 0 : i32
    %c0_i32_0 = arith.constant 0 : i32
    %c0_i32_1 = arith.constant 0 : i32
    return %c0_i32, %c0_i32_0 : i32, i32
  }
  func.func @transform_2(%arg0: i32) -> (i32, i32) {
    %c0_i32 = arith.constant 0 : i32
    %c0_i32_0 = arith.constant 0 : i32
    %c0_i32_1 = arith.constant 0 : i32
    return %c0_i32, %c0_i32_0 : i32, i32
  }
  func.func @transform_3(%arg0: i32) -> (i32, i32, i32) {
    %c0_i32 = arith.constant 0 : i32
    %c0_i32_0 = arith.constant 0 : i32
    %c0_i32_1 = arith.constant 0 : i32
    %c0_i32_2 = arith.constant 0 : i32
    return %c0_i32, %c0_i32_0, %c0_i32_1 : i32, i32, i32
  }
}

</mosaic_0001>

<bundles_post_ra>
// kernel: tpu_custom_call.1
= control target key start
LH: loop header
LB: loop body
LE: loop exit
PB: predicated region body
PF: predicated region fallthrough
CT: control target
= control target key end

     0   :  { %v1163_v4 = vmov 0.0   ;;  %s1361_s0 = inlined_call_operand.vmem [shape: f32[2,8,32], index: 0, kind: input, shape index: {}]   ;;  %s1362_s1 = inlined_call_operand.vmem [shape: f32[32,256], index: 1, kind: input, shape index: {}]   ;;  %s1363_s2 = inlined_call_operand.vmem [shape: f32[64,32], index: 2, kind: input, shape index: {}]   ;;  %s1364_s3 = inlined_call_operand.hbm [shape: f32[2,8,32], index: 3, kind: output, shape index: {}]  }
   0x1   :  { %v24_v0 = vld [vmem:[%s1362_s1 + $0x38] sm:$0xff]  ;;  %v23_v1 = vld [vmem:[%s1362_s1 + $0x30] sm:$0xff]  ;;  %v22_v2 = vld [vmem:[%s1362_s1 + $0x28] sm:$0xff]  ;;  %96 = vmatprep.mubr.f32.mxu1 %v1163_v4  ;;  %1042 = vmatprep.subr.mxu0 %v1163_v4 }
   0x2   :  { %56 = vmatprep.subr.mxu1 %v24_v0  ;;  %v21_v3 = vld [vmem:[%s1362_s1 + $0x20] sm:$0xff]  ;;  %v20_v5 = vld [vmem:[%s1362_s1 + $0x18] sm:$0xff]  ;;  %v19_v6 = vld [vmem:[%s1362_s1 + $0x10] sm:$0xff] }
   0x3   :  { %57 = vmatpush1.msra.mxu1 %v23_v1 }
   0x4   :  { %58 = vmatprep.subr.mxu1 %v22_v2 }
   0x5   :  { %8 = vsyncpa [#allocation4], 0  ;;  %59 = vmatpush1.msra.mxu1 %v21_v3  ;;  %v18_v7 = vld [vmem:[%s1362_s1 + $0x8] sm:$0xff]  ;;  %v17_v8 = vld [vmem:[%s1362_s1] sm:$0xff]  ;;  %vm25_vm0 = vcmask 261120   ;;  %s1164_s1 = smov 120  }
   0x6   :  { %60 = vmatprep.subr.mxu1 %v20_v5  ;;  %v15_v9 = vld [vmem:[%s1361_s0] sm:$0xff]  ;;  %v16_v10 = vld [vmem:[%s1361_s0 + $0x8] sm:$0xff]  ;;  %s1165_s5 = smov 104   ;;  %s1166_s6 = smov 112   ;;  %vm1168_vm1 = vmmov 0   ;;  %vm483_vm2 = vcmask 64512  }
   0x7   :  { %61 = vmatpush1.msra.mxu1 %v19_v6  ;;  %s1167_s0 = smov 96   ;;  %1050 = vmatprep.mubr.msk.f32.mxu0 %vm1168_vm1, %v1163_v4  ;;  %s1169_s7 = smov 64   ;;  %vm881_vm3 = vcmask 523264  }
   0x8   :  { %62 = vmatprep.subr.mxu1 %v18_v7  ;;  %s1170_s24 = smov 32  }
   0x9   :  { %63 = vmatpush1.msra.mxu1 %v17_v8 }
   0xa   :  { %981 = vmatmul.mubr.msk.f32.vlgmr.msra.gmra.mxu1 %vm25_vm0, %v15_v9  ;;  %1031 = vmatprep.subr.mxu1 %v1163_v4 }
   0xb   :  { %102 = vmatprep.mubr.f32.mxu1 %v1163_v4 }
   0xe   :  { %982 = vmatmul.mubr.msk.f32.gmra.mxu1 %vm25_vm0, %v16_v10 }
   0xf   :  { %1039 = vmatprep.mubr.msk.f32.mxu1 %vm1168_vm1, %v1163_v4 }
  0xca   :  { %v1230_v11 = vpop.f32.mrf.mxu1 }
  0xcb   :  { %110 = vrot.lane.b32.xlu1 %v1230_v11, %s1164_s1  ;;  %114 = vrot.lane.b32.xlu0 %v1230_v11, %s1165_s5 }
  0xcc   :  { %v1234_v12 = vpop.f32.mrf.mxu1 }
  0xce   :  { %v1236_v13 = vpop.f32.mrf.mxu1 }
  0xcf   :  { %112 = vrot.lane.b32.xlu0 %v1230_v11, %s1166_s6  ;;  %121 = vrot.lane.b32.xlu1 %v1236_v13, %s1165_s5 }
  0xd0   :  { %v106_v34 = vpop.f32.mrf.mxu1 }
  0xd3   :  { %119 = vrot.lane.b32.xlu0 %v1236_v13, %s1166_s6  ;;  %117 = vrot.lane.b32.xlu1 %v1236_v13, %s1164_s1 }
 0x13d   :  { %v111_v14 = vpop.permute.xlu1 %110  ;;  %v115_v15 = vpop.permute.xlu0 %114 }
 0x13e   :  { %131 = vrot.lane.b32.xlu0 %v115_v15, %s1167_s0 }
 0x141   :  { %v113_v16 = vpop.permute.xlu0 %112  ;;  %v122_v17 = vpop.permute.xlu1 %121 }
 0x142   :  { %127 = vrot.lane.b32.xlu0 %v111_v14, %s1167_s0  ;;  %129 = vrot.lane.b32.xlu1 %v113_v16, %s1167_s0 }
 0x145   :  { %v120_v18 = vpop.permute.xlu0 %119  ;;  %v118_v19 = vpop.permute.xlu1 %117 }
 0x146   :  { %123 = vrot.lane.b32.xlu1 %v1230_v11, %s1167_s0  ;;  %137 = vrot.lane.b32.xlu0 %v122_v17, %s1167_s0 }
 0x14a   :  { %135 = vrot.lane.b32.xlu1 %v120_v18, %s1167_s0  ;;  %133 = vrot.lane.b32.xlu0 %v118_v19, %s1167_s0 }
 0x14e   :  { %125 = vrot.lane.b32.xlu1 %v1236_v13, %s1167_s0  ;;  %153 = vrot.lane.b32.xlu0 %v115_v15, %s1169_s7 }
 0x152   :  { %151 = vrot.lane.b32.xlu0 %v113_v16, %s1169_s7 }
 0x156   :  { %149 = vrot.lane.b32.xlu0 %v111_v14, %s1169_s7 }
 0x15a   :  { %147 = vrot.lane.b32.xlu0 %v1230_v11, %s1169_s7 }
 0x15e   :  { %321 = vrot.lane.b32.xlu0 %v122_v17, %s1169_s7 }
 0x162   :  { %319 = vrot.lane.b32.xlu0 %v120_v18, %s1169_s7 }
 0x166   :  { %317 = vrot.lane.b32.xlu0 %v118_v19, %s1169_s7 }
 0x16a   :  { %315 = vrot.lane.b32.xlu0 %v1236_v13, %s1169_s7 }
 0x16e   :  { %140 = vrot.lane.b32.xlu0 %v1234_v12, %s1167_s0 }
 0x1b0   :  { %v132_v20 = vpop.permute.xlu0 %131 }
 0x1b4   :  { %v128_v21 = vpop.permute.xlu0 %127  ;;  %v130_v22 = vpop.permute.xlu1 %129 }
 0x1b8   :  { %v138_v23 = vpop.permute.xlu0 %137  ;;  %v124_v24 = vpop.permute.xlu1 %123 }
 0x1b9   :  { %231 = vrot.lane.b32.xlu1 %v124_v24, %s1169_s7 }
 0x1bc   :  { %v134_v25 = vpop.permute.xlu0 %133  ;;  %v136_v29 = vpop.permute.xlu1 %135 }
 0x1bd   :  { %237 = vrot.lane.b32.xlu1 %v132_v20, %s1169_s7 }
 0x1c0   :  { %v154_v26 = vpop.permute.xlu0 %153  ;;  %v126_v32 = vpop.permute.xlu1 %125 }
 0x1c1   :  { %1032 = vmatpush3.msra.mxu1 %v154_v26  ;;  %235 = vrot.lane.b32.xlu1 %v130_v22, %s1169_s7 }
 0x1c2   :  { %1033 = vmatprep.subr.mxu1 %v1163_v4 }
 0x1c4   :  { %v152_v27 = vpop.permute.xlu0 %151 }
 0x1c5   :  { %1034 = vmatpush3.msra.mxu1 %v152_v27  ;;  %233 = vrot.lane.b32.xlu1 %v128_v21, %s1169_s7 }
 0x1c6   :  { %1035 = vmatprep.subr.mxu1 %v1163_v4 }
 0x1c8   :  { %v150_v28 = vpop.permute.xlu0 %149 }
 0x1c9   :  { %1036 = vmatpush3.msra.mxu1 %v150_v28  ;;  %405 = vrot.lane.b32.xlu1 %v138_v23, %s1169_s7 }
 0x1ca   :  { %1037 = vmatprep.subr.mxu1 %v1163_v4 }
 0x1cc   :  { %v148_v30 = vpop.permute.xlu0 %147 }
 0x1cd   :  { %1038 = vmatpush3.msra.mxu1 %v148_v30  ;;  %403 = vrot.lane.b32.xlu1 %v136_v29, %s1169_s7 }
 0x1ce   :  { %1040 = vmatmul.mubr.msk.f32.vlgmr.msra.gmra.mxu1 %vm25_vm0, %v1230_v11  ;;  %1053 = vmatprep.subr.mxu1 %v1163_v4 }
 0x1cf   :  { %1061 = vmatprep.mubr.msk.f32.mxu1 %vm1168_vm1, %v1163_v4 }
 0x1d0   :  { %v322_v31 = vpop.permute.xlu0 %321 }
 0x1d1   :  { %1054 = vmatpush3.msra.mxu1 %v322_v31  ;;  %401 = vrot.lane.b32.xlu1 %v134_v25, %s1169_s7 }
 0x1d2   :  { %1055 = vmatprep.subr.mxu1 %v1163_v4 }
 0x1d4   :  { %v320_v33 = vpop.permute.xlu0 %319 }
 0x1d5   :  { %1056 = vmatpush3.msra.mxu1 %v320_v33  ;;  %399 = vrot.lane.b32.xlu1 %v126_v32, %s1169_s7 }
 0x1d6   :  { %1057 = vmatprep.subr.mxu1 %v1163_v4 }
 0x1d8   :  { %v318_v35 = vpop.permute.xlu0 %317 }
 0x1d9   :  { %1058 = vmatpush3.msra.mxu1 %v318_v35  ;;  %144 = vrot.lane.b32.xlu1 %v106_v34, %s1167_s0 }
 0x1da   :  { %1059 = vmatprep.subr.mxu1 %v1163_v4 }
 0x1dc   :  { %v316_v36 = vpop.permute.xlu0 %315 }
 0x1dd   :  { %1060 = vmatpush3.msra.mxu1 %v316_v36 }
 0x1de   :  { %1062 = vmatmul.mubr.msk.f32.vlgmr.msra.gmra.mxu1 %vm25_vm0, %v1236_v13  ;;  %1075 = vmatprep.subr.mxu1 %v1163_v4 }
 0x1df   :  { %1076 = vmatpush3.msra.mxu1 %v1234_v12  ;;  %1077 = vmatprep.mubr.msk.f32.mxu1 %vm1168_vm1, %v1163_v4 }
 0x1e0   :  { %1080 = vmatprep.subr.mxu1 %v1163_v4  ;;  %v141_v22 = vpop.permute.xlu0 %140 }
 0x22b   :  { %v232_v37 = vpop.permute.xlu1 %231 }
 0x22f   :  { %v238_v38 = vpop.permute.xlu1 %237 }
 0x230   :  { %1043 = vmatpush3.msra.mxu0 %v238_v38 }
 0x231   :  { %1044 = vmatprep.subr.mxu0 %v1163_v4 }
 0x233   :  { %v236_v39 = vpop.permute.xlu1 %235 }
 0x234   :  { %1045 = vmatpush3.msra.mxu0 %v236_v39 }
 0x235   :  { %1046 = vmatprep.subr.mxu0 %v1163_v4 }
 0x237   :  { %v234_v40 = vpop.permute.xlu1 %233 }
 0x238   :  { %1047 = vmatpush3.msra.mxu0 %v234_v40 }
 0x239   :  { %1048 = vmatprep.subr.mxu0 %v1163_v4 }
 0x23a   :  { %1049 = vmatpush3.msra.mxu0 %v232_v37 }
 0x23b   :  { %1051 = vmatmul.mubr.msk.f32.vlgmr.msra.gmra.mxu0 %vm25_vm0, %v124_v24  ;;  %1064 = vmatprep.subr.mxu0 %v1163_v4  ;;  %v406_v41 = vpop.permute.xlu1 %405 }
 0x23c   :  { %1065 = vmatpush3.msra.mxu0 %v406_v41  ;;  %1072 = vmatprep.mubr.msk.f32.mxu0 %vm1168_vm1, %v1163_v4 }
 0x23d   :  { %1066 = vmatprep.subr.mxu0 %v1163_v4 }
 0x23f   :  { %v404_v42 = vpop.permute.xlu1 %403 }
 0x240   :  { %1067 = vmatpush3.msra.mxu0 %v404_v42 }
 0x241   :  { %1068 = vmatprep.subr.mxu0 %v1163_v4 }
 0x243   :  { %v402_v43 = vpop.permute.xlu1 %401 }
 0x244   :  { %1069 = vmatpush3.msra.mxu0 %v402_v43 }
 0x245   :  { %1070 = vmatprep.subr.mxu0 %v1163_v4 }
 0x247   :  { %v400_v44 = vpop.permute.xlu1 %399 }
 0x248   :  { %1071 = vmatpush3.msra.mxu0 %v400_v44 }
 0x249   :  { %1073 = vmatmul.mubr.msk.f32.vlgmr.msra.gmra.mxu0 %vm25_vm0, %v126_v32  ;;  %1085 = vmatprep.subr.mxu0 %v1163_v4 }
 0x24a   :  { %1086 = vmatpush3.msra.mxu0 %v106_v34  ;;  %1087 = vmatprep.mubr.msk.f32.mxu0 %vm1168_vm1, %v1163_v4 }
 0x28e   :  { %v227_v45 = vpop.f32.mrf.mxu1 }
 0x28f   :  { %v484_v46 = vsel %vm483_vm2, %v227_v45, -inf }
 0x290   :  { %v485_v47 = vrot.slane %v484_v46, 4  ;;  %v1041_v48 = vpop.f32.mrf.mxu1 }
 0x292   :  { %v486_v49 = vmax.f32 %v484_v46, %v485_v47 }
 0x294   :  { %v487_v50 = vrot.slane %v486_v49, 2 }
 0x296   :  { %v488_v51 = vmax.f32 %v486_v49, %v487_v50 }
 0x298   :  { %v489_v52 = vrot.slane %v488_v51, 1 }
 0x29a   :  { %v490_v53 = vmax.f32 %v488_v51, %v489_v52 }
 0x29c   :  { %v512_v54 = vsub.f32 %v227_v45, %v490_v53 }
 0x29e   :  { %v516_v55 = vmul.f32 1.442695, %v512_v54  ;;  %v395_v56 = vpop.f32.mrf.mxu1 }
 0x29f   :  { %v498_v57 = vsel %vm483_vm2, %v395_v56, -inf }
 0x2a0   :  { %1125 = vpow2.f32 %v516_v55  ;;  %v499_v58 = vrot.slane %v498_v57, 4  ;;  %v1063_v59 = vpop.f32.mrf.mxu1 }
 0x2a2   :  { %v500_v60 = vmax.f32 %v498_v57, %v499_v58 }
 0x2a4   :  { %v501_v61 = vrot.slane %v500_v60, 2 }
 0x2a6   :  { %v502_v62 = vmax.f32 %v500_v60, %v501_v61 }
 0x2a8   :  { %v503_v63 = vrot.slane %v502_v62, 1 }
 0x2aa   :  { %v504_v0 = vmax.f32 %v502_v62, %v503_v63 }
 0x2ac   :  { %v514_v1 = vsub.f32 %v395_v56, %v504_v0 }
 0x2ad   :  { %v1126_v2 = vpop.eup %1125 }
 0x2ae   :  { %v524_v3 = vsel %vm483_vm2, %v1126_v2, 0.0  ;;  %v520_v5 = vmul.f32 1.442695, %v514_v1  ;;  %v145_v1 = vpop.permute.xlu1 %144 }
 0x2af   :  { %v525_v6 = vrot.slane %v524_v3, 4 }
 0x2b0   :  { %1127 = vpow2.f32 %v520_v5 }
 0x2b1   :  { %v526_v7 = vadd.f32 %v525_v6, %v524_v3 }
 0x2b3   :  { %v527_v8 = vrot.slane %v526_v7, 2 }
 0x2b5   :  { %v528_v9 = vadd.f32 %v527_v8, %v526_v7  ;;  %v880_v7 = vld [vmem:[%s1363_s2 + $0x38] sm:$0xff] }
 0x2b6   :  { %1095 = vmatprep.subr.mxu0 %v880_v7 }
 0x2b7   :  { %v529_v10 = vrot.slane %v528_v9, 1 }
 0x2b9   :  { %v530_v11 = vadd.f32 %v529_v10, %v528_v9  ;;  %v878_v10 = vld [vmem:[%s1363_s2 + $0x28] sm:$0xff] }
 0x2bb   :  { %1129 = vrcp.f32 %v530_v11  ;;  %v877_v11 = vld [vmem:[%s1363_s2 + $0x20] sm:$0xff] }
 0x2bd   :  { %v1128_v12 = vpop.eup %1127 }
 0x2be   :  { %v538_v13 = vsel %vm483_vm2, %v1128_v12, 0.0 }
 0x2bf   :  { %v539_v14 = vrot.slane %v538_v13, 4 }
 0x2c1   :  { %v540_v15 = vadd.f32 %v539_v14, %v538_v13  ;;  %v876_v13 = vld [vmem:[%s1363_s2 + $0x18] sm:$0xff] }
 0x2c3   :  { %v541_v16 = vrot.slane %v540_v15, 2 }
 0x2c5   :  { %v542_v17 = vadd.f32 %v541_v16, %v540_v15  ;;  %v875_v15 = vld [vmem:[%s1363_s2 + $0x10] sm:$0xff]  ;;  %v874_v16 = vld [vmem:[%s1363_s2 + $0x8] sm:$0xff] }
 0x2c7   :  { %v543_v18 = vrot.slane %v542_v17, 1 }
 0x2c8   :  { %v1130_v19 = vpop.eup %1129 }
 0x2c9   :  { %v544_v20 = vadd.f32 %v543_v18, %v542_v17  ;;  %v556_v21 = vmul.f32 %v1130_v19, %v1126_v2  ;;  %v873_v17 = vld [vmem:[%s1363_s2] sm:$0xff] }
 0x2cb   :  { %1131 = vrcp.f32 %v544_v20  ;;  %1078 = vmatmul.mubr.msk.f32.vlgmr.msra.gmra.mxu1 %vm483_vm2, %v556_v21 }
 0x2cc   :  { %1081 = vmatpush3.msra.mxu1 %v141_v22  ;;  %1082 = vmatprep.mubr.msk.f32.mxu1 %vm1168_vm1, %v1163_v4 }
 0x2cd   :  { %1090 = vmatprep.subr.mxu1 %v1163_v4 }
 0x2d8   :  { %v1132_v23 = vpop.eup %1131 }
 0x2d9   :  { %v558_v24 = vmul.f32 %v1132_v23, %v1128_v12 }
 0x2db   :  { %1088 = vmatmul.mubr.msk.f32.vlgmr.msra.gmra.mxu0 %vm483_vm2, %v558_v24 }
 0x2dc   :  { %1096 = vmatpush3.msra.mxu0 %v880_v7 }
 0x2fb   :  { %v311_v25 = vpop.f32.mrf.mxu0 }
 0x2fc   :  { %v491_v26 = vsel %vm483_vm2, %v311_v25, -inf }
 0x2fd   :  { %v492_v27 = vrot.slane %v491_v26, 4  ;;  %v1052_v28 = vpop.f32.mrf.mxu0 }
 0x2ff   :  { %v493_v29 = vmax.f32 %v491_v26, %v492_v27 }
 0x301   :  { %v494_v30 = vrot.slane %v493_v29, 2 }
 0x303   :  { %v495_v31 = vmax.f32 %v493_v29, %v494_v30 }
 0x305   :  { %v496_v32 = vrot.slane %v495_v31, 1 }
 0x307   :  { %v497_v33 = vmax.f32 %v495_v31, %v496_v32 }
 0x309   :  { %v513_v34 = vsub.f32 %v311_v25, %v497_v33  ;;  %v479_v35 = vpop.f32.mrf.mxu0 }
 0x30a   :  { %v505_v36 = vsel %vm483_vm2, %v479_v35, -inf }
 0x30b   :  { %v518_v37 = vmul.f32 1.442695, %v513_v34  ;;  %v506_v38 = vrot.slane %v505_v36, 4  ;;  %v1074_v39 = vpop.f32.mrf.mxu0 }
 0x30d   :  { %1133 = vpow2.f32 %v518_v37  ;;  %v507_v40 = vmax.f32 %v505_v36, %v506_v38 }
 0x30f   :  { %v508_v41 = vrot.slane %v507_v40, 2 }
 0x311   :  { %v509_v42 = vmax.f32 %v507_v40, %v508_v41 }
 0x313   :  { %v510_v43 = vrot.slane %v509_v42, 1 }
 0x315   :  { %v511_v44 = vmax.f32 %v509_v42, %v510_v43 }
 0x317   :  { %v515_v45 = vsub.f32 %v479_v35, %v511_v44 }
 0x319   :  { %v522_v46 = vmul.f32 1.442695, %v515_v45 }
 0x31a   :  { %v1134_v47 = vpop.eup %1133 }
 0x31b   :  { %v531_v48 = vsel %vm483_vm2, %v1134_v47, 0.0  ;;  %1135 = vpow2.f32 %v522_v46 }
 0x31c   :  { %v532_v49 = vrot.slane %v531_v48, 4 }
 0x31e   :  { %v533_v50 = vadd.f32 %v532_v49, %v531_v48 }
 0x320   :  { %v534_v51 = vrot.slane %v533_v50, 2 }
 0x322   :  { %v535_v52 = vadd.f32 %v534_v51, %v533_v50 }
 0x324   :  { %v536_v53 = vrot.slane %v535_v52, 1 }
 0x326   :  { %v537_v54 = vadd.f32 %v536_v53, %v535_v52 }
 0x328   :  { %v1136_v55 = vpop.eup %1135  ;;  %1137 = vrcp.f32 %v537_v54 }
 0x329   :  { %v545_v56 = vsel %vm483_vm2, %v1136_v55, 0.0 }
 0x32a   :  { %v546_v57 = vrot.slane %v545_v56, 4 }
 0x32c   :  { %v547_v58 = vadd.f32 %v546_v57, %v545_v56 }
 0x32e   :  { %v548_v59 = vrot.slane %v547_v58, 2 }
 0x330   :  { %v549_v60 = vadd.f32 %v548_v59, %v547_v58 }
 0x332   :  { %v550_v61 = vrot.slane %v549_v60, 1 }
 0x334   :  { %v551_v62 = vadd.f32 %v550_v61, %v549_v60 }
 0x335   :  { %v1138_v63 = vpop.eup %1137 }
 0x336   :  { %1139 = vrcp.f32 %v551_v62  ;;  %v557_v0 = vmul.f32 %v1138_v63, %v1134_v47 }
 0x338   :  { %1083 = vmatmul.mubr.msk.f32.vlgmr.msra.gmra.mxu1 %vm483_vm2, %v557_v0 }
 0x339   :  { %1091 = vmatpush3.msra.mxu1 %v145_v1  ;;  %1092 = vmatprep.mubr.msk.f32.mxu1 %vm1168_vm1, %v1163_v4  ;;  %v879_v4 = vld [vmem:[%s1363_s2 + $0x30] sm:$0xff]  ;;  %s1171_s2 = smov [#allocation3]  }
 0x33a   :  { %1097 = vmatprep.subr.mxu0 %v879_v4  ;;  %s970_s25 = sshll.u32 %s1171_s2, 4  ;;  %s971_s25 = int_to_ptr.vmem [resolvable:$true] %s970_s25 }
 0x33b   :  { %1098 = vmatpush3.msra.mxu0 %v879_v4  ;;  %s1141_s26 = scalar_lea.vmem %s971_s25, 256  ;;  %p1146_p1 = scmp.lt.s32.totalorder %s971_s25, %s971_s25 }
 0x33c   :  { %1099 = vmatprep.subr.mxu0 %v878_v10  ;;  %p1142_p0 = scmp.ne.s32.totalorder %s971_s25, %s1141_s26  ;;  %p1147_p2 = scmp.lt.s32.totalorder %s1141_s26, %s1141_s26 }
 0x33d   :  { %1100 = vmatpush3.msra.mxu0 %v878_v10 }
 0x33e   :  { %1101 = vmatprep.subr.mxu0 %v877_v11  ;;  %p1148_p3 = por %p1147_p2, %p1146_p1 }
 0x33f   :  { %1102 = vmatpush3.msra.mxu0 %v877_v11 }
 0x340   :  { %1103 = vmatprep.subr.mxu0 %v876_v13  ;;  %p1149_p4 = pnand %p1148_p3, %p1142_p0 }
 0x341   :  { %1104 = vmatpush3.msra.mxu0 %v876_v13 }
 0x342   :  { %1105 = vmatprep.subr.mxu0 %v875_v15 }
 0x343   :  { %v1140_v2 = vpop.eup %1139  ;;  %1106 = vmatpush3.msra.mxu0 %v875_v15 }
 0x344   :  { %v559_v3 = vmul.f32 %v1140_v2, %v1136_v55  ;;  %1107 = vmatprep.subr.mxu0 %v874_v16 }
 0x345   :  { %1108 = vmatpush3.msra.mxu0 %v874_v16 }
 0x346   :  { %1093 = vmatmul.mubr.msk.f32.vlgmr.msra.gmra.mxu1 %vm483_vm2, %v559_v3  ;;  %1109 = vmatprep.subr.mxu0 %v873_v17 }
 0x347   :  { %1110 = vmatpush3.msra.mxu0 %v873_v17 }
 0x38b   :  { %v629_v5 = vpop.f32.mrf.mxu1 }
 0x38c   :  { %852 = vst.msk [vmem:[#allocation2] sm:$0xff] %vm25_vm0, %v629_v5 }
 0x38d   :  { %v1079_v6 = vpop.f32.mrf.mxu1 }
 0x39b   :  { %v775_v8 = vpop.f32.mrf.mxu0 }
 0x39c   :  { %854 = vst.msk [vmem:[#allocation2 + $0x10] sm:$0xff] %vm25_vm0, %v775_v8 }
 0x39d   :  { %v1089_v9 = vpop.f32.mrf.mxu0 }
 0x3f8   :  { %v702_v12 = vpop.f32.mrf.mxu1 }
 0x3f9   :  { %853 = vst.msk [vmem:[#allocation2 + $0x8] sm:$0xff] %vm25_vm0, %v702_v12 }
 0x3fa   :  { %v1084_v14 = vpop.f32.mrf.mxu1 }
 0x400   :  { %v858_v18 = vld [vmem:[#allocation2 + $0x1] ss:$2 sm:$0xff]  ;;  %v856_v23 = vld [vmem:[#allocation2] ss:$2 sm:$0xff] }
 0x401   :  { %860 = vrot.lane.b32.xlu0 %v858_v18, %s1170_s24 }
 0x406   :  { %v848_v19 = vpop.f32.mrf.mxu1 }
 0x407   :  { %855 = vst.msk [vmem:[#allocation2 + $0x18] sm:$0xff] %vm25_vm0, %v848_v19 }
 0x408   :  { %v1094_v20 = vpop.f32.mrf.mxu1 }
 0x40e   :  { %v867_v21 = vld [vmem:[#allocation2 + $0x11] ss:$2 sm:$0xff]  ;;  %v865_v26 = vld [vmem:[#allocation2 + $0x10] ss:$2 sm:$0xff] }
 0x40f   :  { %869 = vrot.lane.b32.xlu1 %v867_v21, %s1170_s24 }
 0x473   :  { %v861_v22 = vpop.permute.xlu0 %860 }
 0x474   :  { %v863_v24 = vsel %vm25_vm0, %v856_v23, %v861_v22 }
 0x475   :  { %1111 = vmatprep.mubr.msk.f32.mxu0 %vm881_vm3, %v863_v24 }
 0x481   :  { %v870_v25 = vpop.permute.xlu1 %869 }
 0x482   :  { %v872_v27 = vsel %vm25_vm0, %v865_v26, %v870_v25 }
 0x483   :  { %1112 = vmatmul.mubr.msk.f32.vlgmr.msra.gmra.mxu0 %vm881_vm3, %v872_v27 }
 0x543   :  { %v1113_v28 = vpop.f32.mrf.mxu0 }
 0x544   :  { %964 = vst.msk [vmem:[#allocation3 + $0x8] sm:$0xff] %vm25_vm0, %v1113_v28 }
 0x545   :  { %v954_v29 = vpop.f32.mrf.mxu0 }
 0x546   :  { %963 = vst.msk [vmem:[#allocation3] sm:$0xff] %vm25_vm0, %v954_v29 }
 0x547   :  { %1152 = shalt.err (!%p1149_p4)
}
 0x548   :  { %s1172_s27 = smov 128   ;;  %s1173_s28 = smov 8  }
 0x549   :  { %976 = dma.vmem_to_hbm [thread:$0]  %s971_s25, 256, %s1364_s3, [#allocation4], %s1172_s27, %s1172_s27, %s1173_s28  }
 0x54a   :  { %1161 = dma.done.wait [#allocation4], 256  }
 0x54b   :  { %1162 = vsyncadd [#allocation4], 4294967040 }
 0x54c   :  { %980 = vsyncpa [#allocation4], 1 }

</bundles_post_ra>
